<compile_context>
chip_gen: v7x
topology: tpu7x:2x2x1
jax: 0.10.0
libtpu: 0.0.40
codegen_flags: <defaults>
</compile_context>

<pallas_src>
import jax
import jax.numpy as jnp
from jax import lax
from jax.experimental import pallas as pl
from jax.experimental.pallas import tpu as pltpu


def gating_kernel(x_ref, w_ref, b_ref, o_ref):
    # logits[e, t] = sum_h w[e, h] * x[t, h]   (transposed layout: tokens on lanes)
    logits = lax.dot_general(
        w_ref[...], x_ref[...],
        dimension_numbers=(((1,), (1,)), ((), ())),
        preferred_element_type=jnp.float32,
    ) + b_ref[...]                                   # (E, tm) + (E, 1)

    # Numerically stable softmax over the expert (sublane) axis.
    m = jnp.max(logits, axis=0, keepdims=True)       # (1, tm)
    e = jnp.exp(logits - m)                          # (E, tm)
    denom = jnp.sum(e, axis=0, keepdims=True)        # (1, tm)
    # Exact reciprocal: kernel is DMA-bound, so the VALU cost is hidden and the
    # 1e-5 accuracy contract vs. the reference holds.
    o_ref[...] = (e * pl.reciprocal(denom, approx=False)).astype(o_ref.dtype)


def gating_forward(inputs, weight, bias, *, target_tile_bytes=None):
    """inputs: (..., H); weight: (E, H) torch nn.Linear convention; bias: (E,)."""
    *lead, H = inputs.shape
    E, H_w = weight.shape
    assert H_w == H, "weight must be (num_experts, hidden)"

    x = inputs.reshape(-1, H)                        # (T, H) flattened tokens
    T = x.shape[0]
    x_itemsize = jnp.dtype(x.dtype).itemsize
    w_itemsize = jnp.dtype(weight.dtype).itemsize
    o_itemsize = jnp.dtype(inputs.dtype).itemsize

    # VMEM capacity per generation (v5e/v6e: 128 MiB, v7x: 64 MiB per TC).
    try:
        vmem_cap = int(pltpu.get_tpu_info().vmem_capacity_bytes)
    except Exception:
        vmem_cap = 64 << 20

    if target_tile_bytes is None:
        # Multi-MiB streaming tile: big enough to amortize the ~0.35us per-step
        # overhead and saturate HBM, small enough to double-buffer comfortably.
        target_tile_bytes = max(4 << 20, min(16 << 20, vmem_cap // 8))

    rows = max(1, target_tile_bytes // (H * x_itemsize))
    if rows >= T:
        tm = T                                       # single block: full token extent
    else:
        # Multiple of 128 so the (E, tm) out block is lane-dense/aligned; the last
        # grid block may be ragged (Pallas masks it).
        tm = max(128, (rows // 128) * 128)

    def footprint(tm_):
        return (2 * tm_ * H * x_itemsize             # double-buffered x tile
                + 2 * E * tm_ * o_itemsize           # double-buffered out tile
                + 2 * (E * H + E) * w_itemsize       # resident weight + bias buffers
                + (2 << 20))                         # headroom

    budget = (vmem_cap * 3) // 4
    while tm > 128 and footprint(tm) > budget:       # only relevant for huge H
        tm -= 128

    n_tiles = pl.cdiv(T, tm)
    vmem_limit = int(min(max(footprint(tm), 16 << 20), budget))

    b = bias.reshape(E, 1)                           # broadcast across lanes in-kernel

    probs_t = pl.pallas_call(
        gating_kernel,
        out_shape=jax.ShapeDtypeStruct((E, T), inputs.dtype),
        grid_spec=pltpu.PrefetchScalarGridSpec(
            num_scalar_prefetch=0,
            grid=(n_tiles,),
            in_specs=[
                pl.BlockSpec((tm, H), lambda i: (i, 0)),   # streamed token tiles
                pl.BlockSpec((E, H), lambda i: (0, 0)),    # weight: VMEM-resident
                pl.BlockSpec((E, 1), lambda i: (0, 0)),    # bias:   VMEM-resident
            ],
            out_specs=pl.BlockSpec((E, tm), lambda i: (0, i)),
        ),
        compiler_params=pltpu.CompilerParams(
            # Tokens are fully independent (per-token softmax, no accumulator).
            # On v7x, pltpu.CORE_PARALLEL here would shard the axis across both TCs.
            dimension_semantics=("parallel",),
            vmem_limit_bytes=vmem_limit,
        ),
    )(x, weight, b)

    # Tiny (E, T) -> (T, E) relayout in XLA, then restore leading dims.
    return probs_t.T.reshape(*lead, E)


if __name__ == "__main__":
    # config: moe_hidden_size=32, num_experts=8 ; inputs (batch=2, seq=8, hidden=32)
    B, S, H, E = 2, 8, 32, 8

    key = jax.random.PRNGKey(0)
    kx, kw, kb = jax.random.split(key, 3)

    x = jax.random.normal(kx, (B, S, H), dtype=jnp.float32)
    # torch nn.Linear keeps weight as (out_features, in_features)
    bound = 1.0 / (H ** 0.5)
    weight = jax.random.uniform(kw, (E, H), minval=-bound, maxval=bound, dtype=jnp.float32)
    bias = jax.random.uniform(kb, (E,), minval=-bound, maxval=bound, dtype=jnp.float32)

    out = gating_forward(x, weight, bias)
    out = jax.block_until_ready(out)

    # sanity check against pure-JAX reference
    ref = jax.nn.softmax(x @ weight.T + bias, axis=-1)
    assert out.shape == (B, S, E)
    assert jnp.allclose(out, ref, atol=1e-5, rtol=1e-5)
    assert jnp.allclose(jnp.sum(out, axis=-1), 1.0, atol=1e-5)

    print("KERNEL_OK")
</pallas_src>

<mosaic_0001>
module attributes {stable_mosaic.version = 11 : i64} {
  func.func @gating_kernel(%arg0: i32, %arg1: memref<16x32xf32, #tpu.memory_space<vmem>>, %arg2: memref<8x32xf32, #tpu.memory_space<vmem>>, %arg3: memref<8x1xf32, #tpu.memory_space<vmem>>, %arg4: memref<8x16xf32, #tpu.memory_space<vmem>>) attributes {dimension_semantics = [#tpu.dimension_semantics<parallel>], iteration_bounds = array<i64: 1>, scalar_prefetch = 0 : i64, scratch_operands = 0 : i64, tpu.core_type = #tpu.core_type<tc>, window_params = [{transform_indices = @transform_0, window_bounds = array<i64: 16, 32>}, {pipeline_mode = #tpu.pipeline_mode<synchronous>, transform_indices = @transform_1, window_bounds = array<i64: 8, 32>}, {pipeline_mode = #tpu.pipeline_mode<synchronous>, transform_indices = @transform_2, window_bounds = array<i64: 8, 1>}, {transform_indices = @transform_3, window_bounds = array<i64: 8, 16>}]} {
    %c0 = arith.constant 0 : index
    %c0_0 = arith.constant 0 : index
    %0 = vector.load %arg2[%c0, %c0_0] : memref<8x32xf32, #tpu.memory_space<vmem>>, vector<8x32xf32>
    %c0_1 = arith.constant 0 : index
    %c0_2 = arith.constant 0 : index
    %1 = vector.load %arg1[%c0_1, %c0_2] : memref<16x32xf32, #tpu.memory_space<vmem>>, vector<16x32xf32>
    %cst = arith.constant dense<0.000000e+00> : vector<8x16xf32>
    %2 = tpu.matmul %0, %1, %cst {dimension_numbers = #tpu.dot_dimension_numbers<[1], [1], [0], [0], [0, 0, 1, 0], [], []>} : vector<8x32xf32>, vector<16x32xf32>, vector<8x16xf32> -> vector<8x16xf32>
    %c0_3 = arith.constant 0 : index
    %c0_4 = arith.constant 0 : index
    %3 = vector.load %arg3[%c0_3, %c0_4] : memref<8x1xf32, #tpu.memory_space<vmem>>, vector<8x1xf32>
    %4 = vector.broadcast %3 : vector<8x1xf32> to vector<8x16xf32>
    %5 = arith.addf %2, %4 : vector<8x16xf32>
    %cst_5 = arith.constant dense<0xFF800000> : vector<16xf32>
    %6 = vector.multi_reduction <maximumf>, %5, %cst_5 [0] : vector<8x16xf32> to vector<16xf32>
    %7 = vector.shape_cast %6 : vector<16xf32> to vector<1x16xf32>
    %8 = vector.broadcast %7 : vector<1x16xf32> to vector<8x16xf32>
    %9 = arith.subf %5, %8 : vector<8x16xf32>
    %10 = math.exp %9 : vector<8x16xf32>
    %cst_6 = arith.constant dense<0.000000e+00> : vector<16xf32>
    %11 = vector.multi_reduction <add>, %10, %cst_6 [0] : vector<8x16xf32> to vector<16xf32>
    %12 = vector.shape_cast %11 : vector<16xf32> to vector<1x16xf32>
    %13 = tpu.reciprocal %12 : vector<1x16xf32> -> vector<1x16xf32>
    %14 = vector.broadcast %13 : vector<1x16xf32> to vector<8x16xf32>
    %15 = arith.mulf %10, %14 : vector<8x16xf32>
    %c0_7 = arith.constant 0 : index
    %c0_8 = arith.constant 0 : index
    %16 = vector.load %arg4[%c0_7, %c0_8] : memref<8x16xf32, #tpu.memory_space<vmem>>, vector<8x16xf32>
    tpu.vector_store %arg4[%c0_7, %c0_8], %15 {strides = array<i32>} : memref<8x16xf32, #tpu.memory_space<vmem>>, vector<8x16xf32>,
    return
  }
  func.func @transform_0(%arg0: i32) -> (i32, i32) {
    %c0_i32 = arith.constant 0 : i32
    %c0_i32_0 = arith.constant 0 : i32
    return %arg0, %c0_i32 : i32, i32
  }
  func.func @transform_1(%arg0: i32) -> (i32, i32) {
    %c0_i32 = arith.constant 0 : i32
    %c0_i32_0 = arith.constant 0 : i32
    %c0_i32_1 = arith.constant 0 : i32
    return %c0_i32, %c0_i32_0 : i32, i32
  }
  func.func @transform_2(%arg0: i32) -> (i32, i32) {
    %c0_i32 = arith.constant 0 : i32
    %c0_i32_0 = arith.constant 0 : i32
    %c0_i32_1 = arith.constant 0 : i32
    return %c0_i32, %c0_i32_0 : i32, i32
  }
  func.func @transform_3(%arg0: i32) -> (i32, i32) {
    %c0_i32 = arith.constant 0 : i32
    %c0_i32_0 = arith.constant 0 : i32
    return %c0_i32, %arg0 : i32, i32
  }
}

</mosaic_0001>

<bundles_post_ra>
// kernel: tpu_custom_call.1
= control target key start
LH: loop header
LB: loop body
LE: loop exit
PB: predicated region body
PF: predicated region fallthrough
CT: control target
= control target key end

     0   :  { %8 = vsyncpa [#allocation3], 0  ;;  %s293_s0 = inlined_call_operand.hbm [shape: f32[16,32], index: 0, kind: input, shape index: {}]   ;;  %s294_s1 = inlined_call_operand.vmem [shape: f32[8,32], index: 1, kind: input, shape index: {}]   ;;  %s295_s2 = inlined_call_operand.vmem [shape: f32[8,1], index: 2, kind: input, shape index: {}]   ;;  %s296_s3 = inlined_call_operand.hbm [shape: f32[8,16], index: 3, kind: output, shape index: {}]  }
   0x1   :  { %9 = vsyncpa [#allocation4], 0  ;;  %s232_s12 = smov [#allocation2]   ;;  %s184_s16 = scalar_lea.hbm %s293_s0, 256 }
   0x2   :  { %s15_s13 = sshll.u32 %s232_s12, 4  ;;  %p185_p0 = scmp.ne.s32.totalorder %s293_s0, %s184_s16  ;;  %s16_s13 = int_to_ptr.vmem [resolvable:$true] %s15_s13 }
   0x3   :  { %p188_p1 = scmp.lt.u32.totalorder %s184_s16, %s293_s0 }
   0x5   :  { %p190_p2 = pnand %p188_p1, %p185_p0 }
   0x7   :  { %193 = shalt.err (!%p190_p2)
}
   0x8   :  { %s194_s21 = scalar_lea.vmem %s16_s13, 256  ;;  %p199_p4 = scmp.lt.s32.totalorder %s16_s13, %s16_s13 }
   0x9   :  { %p195_p3 = scmp.ne.s32.totalorder %s16_s13, %s194_s21  ;;  %p200_p5 = scmp.lt.s32.totalorder %s194_s21, %s194_s21 }
   0xb   :  { %p201_p6 = por %p200_p5, %p199_p4 }
   0xd   :  { %p202_p7 = pnand %p201_p6, %p195_p3 }
   0xf   :  { %205 = shalt.err (!%p202_p7)
}
  0x10   :  { %s233_s22 = smov 128   ;;  %s234_s23 = smov 8  }
  0x11   :  { %21 = dma.hbm_to_vmem [thread:$0]  %s293_s0, 256, %s16_s13, [#allocation3], %s233_s22, %s233_s22, %s234_s23  }
  0x12   :  { %228 = dma.done.wait [#allocation3], 256  }
  0x13   :  { %229 = vsyncadd [#allocation3], 4294967040  ;;  %v235_v0 = vmov 0.0|0.0   ;;  %vm236_vm0 = vmmov 0   ;;  %v237_v1 = vmov 0.0   ;;  %v238_v2 = vmov 0  }
  0x14   :  { %167 = vmatprep.subr.bf16.mxu0 %v235_v0  ;;  %164 = vmatprep.mubr.msk.f32.mxu0 %vm236_vm0, %v237_v1  ;;  %vm38_vm1 = vcmask 261120   ;;  %v30_v3 = vld [vmem:[#allocation2] sm:$0xff]  ;;  %v31_v4 = vld [vmem:[#allocation2 + $0x8] sm:$0xff]  ;;  %vm118_vm3 = vcmask 130048  }
  0x15   :  { %179 = vset.pattern.permute.xlu0 %v238_v2  ;;  %vm169_vm2 = vmpackc.low %vm38_vm1, %vm38_vm1  ;;  %v168_v5 = vpack.c.bf16 %v31_v4, %v30_v3  ;;  %v32_v6 = vld [vmem:[%s295_s2] sm:$0xff] }
  0x16   :  { %35 = vperm.xlu0 %179, %v32_v6   ;;  %v29_v7 = vld [vmem:[%s294_s1] sm:$0xff]  ;;  %s239_s1 = smov [#allocation5]  }
  0x17   :  { %170 = vmatpush3.bf16.xpose.msk.msra.mxu0 %vm169_vm2, %v168_v5  ;;  %s145_s2 = sshll.u32 %s239_s1, 4  ;;  %s146_s2 = int_to_ptr.vmem [resolvable:$true] %s145_s2 }
  0x18   :  { %s206_s29 = scalar_lea.vmem %s146_s2, 128  ;;  %p211_p9 = scmp.lt.s32.totalorder %s146_s2, %s146_s2 }
  0x19   :  { %p207_p8 = scmp.ne.s32.totalorder %s146_s2, %s206_s29  ;;  %p212_p10 = scmp.lt.s32.totalorder %s206_s29, %s206_s29 }
  0x1b   :  { %p213_p11 = por %p212_p10, %p211_p9 }
  0x1d   :  { %p214_p12 = pnand %p213_p11, %p207_p8 }
  0x1e   :  { %165 = vmatmul.mubr.msk.f32.vlgmr.msra.gmra.mrb[0].mxu0 %vm38_vm1, %v29_v7 }
  0x95   :  { %v36_v8 = vpop.permute.xlu0 %35 }
  0xf1   :  { %v114_v9 = vpop.f32.mrb[0].mxu0 }
  0xf2   :  { %v115_v10 = vadd.f32 %v114_v9, %v36_v8  ;;  %v166_v11 = vpop.f32.mrb[1].mxu0 }
  0xf4   :  { %v119_v12 = vsel %vm118_vm3, %v115_v10, -inf }
  0xf5   :  { %v120_v13 = vrot.slane %v119_v12, 4 }
  0xf7   :  { %v121_v14 = vmax.f32 %v119_v12, %v120_v13 }
  0xf9   :  { %v122_v15 = vrot.slane %v121_v14, 2 }
  0xfb   :  { %v123_v16 = vmax.f32 %v121_v14, %v122_v15 }
  0xfd   :  { %v124_v17 = vrot.slane %v123_v16, 1 }
  0xff   :  { %v125_v18 = vmax.f32 %v123_v16, %v124_v17 }
 0x101   :  { %v126_v19 = vsub.f32 %v115_v10, %v125_v18 }
 0x103   :  { %v127_v20 = vmul.f32 1.442695, %v126_v19 }
 0x105   :  { %180 = vpow2.f32 %v127_v20 }
 0x10f   :  { %v181_v21 = vpop.eup %180 }
 0x110   :  { %v129_v22 = vsel %vm118_vm3, %v181_v21, 0.0 }
 0x111   :  { %v130_v23 = vrot.slane %v129_v22, 4 }
 0x113   :  { %v131_v24 = vadd.f32 %v130_v23, %v129_v22 }
 0x115   :  { %v132_v25 = vrot.slane %v131_v24, 2 }
 0x117   :  { %v133_v26 = vadd.f32 %v132_v25, %v131_v24 }
 0x119   :  { %v134_v27 = vrot.slane %v133_v26, 1 }
 0x11b   :  { %v135_v28 = vadd.f32 %v134_v27, %v133_v26 }
 0x11d   :  { %182 = vrcp.f32 %v135_v28 }
 0x127   :  { %v183_v29 = vpop.eup %182 }
 0x128   :  { %v137_v30 = vmul.f32 %v183_v29, %v181_v21 }
 0x12a   :  { %138 = vst.msk [vmem:[#allocation5] sm:$0xff] %vm118_vm3, %v137_v30 }
 0x12b   :  { %217 = shalt.err (!%p214_p12)
}
 0x12c   :  { %s218_s5 = scalar_lea.hbm %s296_s3, 128 }
 0x12d   :  { %p219_p13 = scmp.ne.s32.totalorder %s296_s3, %s218_s5  ;;  %p222_p0 = scmp.lt.u32.totalorder %s218_s5, %s296_s3 }
 0x12f   :  { %p224_p1 = pnand %p222_p0, %p219_p13 }
 0x131   :  { %227 = shalt.err (!%p224_p1)
}
 0x132   :  { %148 = dma.vmem_to_hbm [thread:$0]  %s146_s2, 128, %s296_s3, [#allocation4]  }
 0x133   :  { %230 = dma.done.wait [#allocation4], 128  }
 0x134   :  { %231 = vsyncadd [#allocation4], 4294967168 }
 0x135   :  { %152 = vsyncpa [#allocation3], 1 }
 0x136   :  { %153 = vsyncpa [#allocation4], 1 }

</bundles_post_ra>
